<compile_context>
chip_gen: v6e
topology: v6e:2x2x1
jax: 0.10.0
libtpu: 0.0.40
codegen_flags: <defaults>
</compile_context>

<pallas_src>
import jax
import jax.numpy as jnp
import numpy as np
from jax.experimental import pallas as pl
from jax.experimental.pallas import tpu as pltpu

KH = KW = 3  # spatial kernel of the Conv3d is (k, 3, 3)


def _make_kernel(H, W, CinD, Cout):
    """Kernel closure with static shapes baked in."""
    Hout, Wout = H - (KH - 1), W - (KW - 1)
    M = Hout * Wout

    def kernel(x_ref, w_ref, o_ref):
        # x_ref: (1, H, W, CinD)   one image, channels-last, depth folded into channels
        # w_ref: (KH*KW, CinD, Cout)
        # o_ref: (1, M, Cout)      M = Hout*Wout, Cout unpadded (full last dim)
        xt = x_ref[0]                                     # (H, W, CinD), VMEM resident
        acc = jnp.zeros((M, Cout), jnp.float32)           # f32 accumulation
        for kh in range(KH):
            for kw in range(KW):
                # 9-tap "im2col" built from the VMEM tile: static slice + leading-dim
                # merge (layout-trivial when Wout % 8 == 0).  No HBM traffic here.
                lhs = xt[kh:kh + Hout, kw:kw + Wout, :].reshape(M, CinD)
                acc = acc + jnp.dot(lhs, w_ref[kh * KW + kw],
                                    preferred_element_type=jnp.float32)
        o_ref[0] = acc.astype(o_ref.dtype)

    return kernel


def spa_module_in(x_ncdhw, weight_oidhw, *, compute_dtype=jnp.bfloat16):
    """Forward of SPAModuleIN.

    x_ncdhw:      (N, Cin, D, H, W)   with D == k
    weight_oidhw: (Cout, Cin, k, 3, 3)
    returns:      (N, Cout, H-2, W-2)

    compute_dtype: matmul operand dtype (default bf16 on all TPU generations — the
    MXU is bf16-native and the kernel is input-traffic bound).  Accumulation is
    always f32.  Pass None for exact f32 operands.
    """
    N, Cin, D, H, W = x_ncdhw.shape
    Cout, Cin_w, k, kh_, kw_ = weight_oidhw.shape
    assert Cin == Cin_w and kh_ == KH and kw_ == KW
    assert D == k, "squeeze(2) semantics require depth == k (valid conv -> depth 1)"

    Hout, Wout = H - (KH - 1), W - (KW - 1)
    CinD = Cin * D
    M = Hout * Wout
    out_dtype = x_ncdhw.dtype
    op_dtype = out_dtype if compute_dtype is None else compute_dtype

    # ---- layout plumbing in plain JAX (one cheap pass; NO im2col / pad passes) ----
    # (N, Cin, D, H, W) -> (N, H, W, Cin*D): channels-last, depth folded; cast once.
    x_nhwc = jnp.transpose(
        x_ncdhw.reshape(N, CinD, H, W).astype(op_dtype), (0, 2, 3, 1))
    # weight (Cout, Cin, k, 3, 3) -> (KH*KW, Cin*k, Cout); the cd = ci*k + d channel
    # folding and the tap order match the kernel's slicing order above.
    w_taps = jnp.transpose(
        weight_oidhw.reshape(Cout, CinD, KH, KW).astype(op_dtype),
        (2, 3, 1, 0)).reshape(KH * KW, CinD, Cout)

    kernel = _make_kernel(H, W, CinD, Cout)

    out2 = pl.pallas_call(
        kernel,
        out_shape=jax.ShapeDtypeStruct((N, M, Cout), out_dtype),
        grid=(N,),
        in_specs=[
            # Full-extent last two dims -> no (8,128) divisibility issues.
            pl.BlockSpec((1, H, W, CinD), lambda n: (n, 0, 0, 0)),
            pl.BlockSpec((KH * KW, CinD, Cout), lambda n: (0, 0, 0)),  # resident weight
        ],
        out_specs=pl.BlockSpec((1, M, Cout), lambda n: (n, 0, 0)),
        compiler_params=pltpu.CompilerParams(
            dimension_semantics=("parallel",)),   # N>=2 => both v7x TCs get work
    )(x_nhwc, w_taps)

    # (N, Hout*Wout, Cout) -> (N, Cout, Hout, Wout): transpose of the SMALL output only.
    return jnp.transpose(out2, (0, 2, 1)).reshape(N, Cout, Hout, Wout)


def reference_forward(x_ncdhw, weight_oidhw):
    """Pure-JAX reference (XLA conv) for correctness checking."""
    out = jax.lax.conv_general_dilated(
        x_ncdhw, weight_oidhw,
        window_strides=(1, 1, 1), padding="VALID",
        dimension_numbers=("NCDHW", "OIDHW", "NCDHW"))
    return jnp.squeeze(out, axis=2)


if __name__ == "__main__":
    # Small shapes consistent with the module: in_channels=4, out_channels=8, k=7.
    N, Cin, Cout, k = 2, 4, 8, 7
    H = W = 10

    key = jax.random.PRNGKey(0)
    kx, kw_ = jax.random.split(key)
    x = jax.random.normal(kx, (N, Cin, k, H, W), dtype=jnp.float32)
    # Conv3d(in, out, kernel_size=(k, 3, 3), bias=False) weight
    weight = 0.1 * jax.random.normal(kw_, (Cout, Cin, k, KH, KW), dtype=jnp.float32)

    ref = jax.block_until_ready(reference_forward(x, weight))

    # Default (bf16 operands, f32 accumulation) vs f32 XLA conv -> looser tolerance.
    out = jax.block_until_ready(spa_module_in(x, weight))
    assert out.shape == (N, Cout, H - 2, W - 2), out.shape
    np.testing.assert_allclose(np.asarray(out), np.asarray(ref), rtol=2e-2, atol=2.5e-2)

    # Exact f32-operand path stays tight.
    out_f32 = jax.block_until_ready(spa_module_in(x, weight, compute_dtype=None))
    np.testing.assert_allclose(np.asarray(out_f32), np.asarray(ref), rtol=1e-4, atol=1e-4)

    print("KERNEL_OK")
</pallas_src>

<mosaic_0001>
module attributes {stable_mosaic.version = 11 : i64} {
  func.func @kernel(%arg0: i32, %arg1: memref<1x10x10x28xbf16, #tpu.memory_space<vmem>>, %arg2: memref<9x28x8xbf16, #tpu.memory_space<vmem>>, %arg3: memref<1x64x8xf32, #tpu.memory_space<vmem>>) attributes {dimension_semantics = [#tpu.dimension_semantics<parallel>], iteration_bounds = array<i64: 2>, scalar_prefetch = 0 : i64, scratch_operands = 0 : i64, tpu.core_type = #tpu.core_type<tc>, window_params = [{transform_indices = @transform_0, window_bounds = array<i64: 1, 10, 10, 28>}, {pipeline_mode = #tpu.pipeline_mode<synchronous>, transform_indices = @transform_1, window_bounds = array<i64: 9, 28, 8>}, {transform_indices = @transform_2, window_bounds = array<i64: 1, 64, 8>}]} {
    %c0 = arith.constant 0 : index
    %c0_0 = arith.constant 0 : index
    %c0_1 = arith.constant 0 : index
    %c0_2 = arith.constant 0 : index
    %0 = vector.load %arg1[%c0, %c0_0, %c0_1, %c0_2] : memref<1x10x10x28xbf16, #tpu.memory_space<vmem>>, vector<1x10x10x28xbf16>
    %1 = vector.shape_cast %0 : vector<1x10x10x28xbf16> to vector<10x10x28xbf16>
    %cst = arith.constant 0.000000e+00 : f32
    %2 = vector.broadcast %cst : f32 to vector<64x8xf32>
    %3 = vector.extract_strided_slice %1 {offsets = [0, 0, 0], sizes = [8, 8, 28], strides = [1, 1, 1]} : vector<10x10x28xbf16> to vector<8x8x28xbf16>
    %4 = vector.shape_cast %3 : vector<8x8x28xbf16> to vector<64x28xbf16>
    %c0_3 = arith.constant 0 : index
    %c0_4 = arith.constant 0 : index
    %c0_5 = arith.constant 0 : index
    %5 = vector.load %arg2[%c0_3, %c0_4, %c0_5] : memref<9x28x8xbf16, #tpu.memory_space<vmem>>, vector<1x28x8xbf16>
    %6 = vector.shape_cast %5 : vector<1x28x8xbf16> to vector<28x8xbf16>
    %cst_6 = arith.constant dense<0.000000e+00> : vector<64x8xf32>
    %7 = tpu.matmul %4, %6, %cst_6 {dimension_numbers = #tpu.dot_dimension_numbers<[1], [0], [0], [1], [0, 0, 1, 1], [], []>} : vector<64x28xbf16>, vector<28x8xbf16>, vector<64x8xf32> -> vector<64x8xf32>
    %8 = arith.addf %2, %7 : vector<64x8xf32>
    %9 = vector.extract_strided_slice %1 {offsets = [0, 1, 0], sizes = [8, 8, 28], strides = [1, 1, 1]} : vector<10x10x28xbf16> to vector<8x8x28xbf16>
    %10 = vector.shape_cast %9 : vector<8x8x28xbf16> to vector<64x28xbf16>
    %c1 = arith.constant 1 : index
    %c0_7 = arith.constant 0 : index
    %c0_8 = arith.constant 0 : index
    %11 = vector.load %arg2[%c1, %c0_7, %c0_8] : memref<9x28x8xbf16, #tpu.memory_space<vmem>>, vector<1x28x8xbf16>
    %12 = vector.shape_cast %11 : vector<1x28x8xbf16> to vector<28x8xbf16>
    %cst_9 = arith.constant dense<0.000000e+00> : vector<64x8xf32>
    %13 = tpu.matmul %10, %12, %cst_9 {dimension_numbers = #tpu.dot_dimension_numbers<[1], [0], [0], [1], [0, 0, 1, 1], [], []>} : vector<64x28xbf16>, vector<28x8xbf16>, vector<64x8xf32> -> vector<64x8xf32>
    %14 = arith.addf %8, %13 : vector<64x8xf32>
    %15 = vector.extract_strided_slice %1 {offsets = [0, 2, 0], sizes = [8, 8, 28], strides = [1, 1, 1]} : vector<10x10x28xbf16> to vector<8x8x28xbf16>
    %16 = vector.shape_cast %15 : vector<8x8x28xbf16> to vector<64x28xbf16>
    %c2 = arith.constant 2 : index
    %c0_10 = arith.constant 0 : index
    %c0_11 = arith.constant 0 : index
    %17 = vector.load %arg2[%c2, %c0_10, %c0_11] : memref<9x28x8xbf16, #tpu.memory_space<vmem>>, vector<1x28x8xbf16>
    %18 = vector.shape_cast %17 : vector<1x28x8xbf16> to vector<28x8xbf16>
    %cst_12 = arith.constant dense<0.000000e+00> : vector<64x8xf32>
    %19 = tpu.matmul %16, %18, %cst_12 {dimension_numbers = #tpu.dot_dimension_numbers<[1], [0], [0], [1], [0, 0, 1, 1], [], []>} : vector<64x28xbf16>, vector<28x8xbf16>, vector<64x8xf32> -> vector<64x8xf32>
    %20 = arith.addf %14, %19 : vector<64x8xf32>
    %21 = vector.extract_strided_slice %1 {offsets = [1, 0, 0], sizes = [8, 8, 28], strides = [1, 1, 1]} : vector<10x10x28xbf16> to vector<8x8x28xbf16>
    %22 = vector.shape_cast %21 : vector<8x8x28xbf16> to vector<64x28xbf16>
    %c3 = arith.constant 3 : index
    %c0_13 = arith.constant 0 : index
    %c0_14 = arith.constant 0 : index
    %23 = vector.load %arg2[%c3, %c0_13, %c0_14] : memref<9x28x8xbf16, #tpu.memory_space<vmem>>, vector<1x28x8xbf16>
    %24 = vector.shape_cast %23 : vector<1x28x8xbf16> to vector<28x8xbf16>
    %cst_15 = arith.constant dense<0.000000e+00> : vector<64x8xf32>
    %25 = tpu.matmul %22, %24, %cst_15 {dimension_numbers = #tpu.dot_dimension_numbers<[1], [0], [0], [1], [0, 0, 1, 1], [], []>} : vector<64x28xbf16>, vector<28x8xbf16>, vector<64x8xf32> -> vector<64x8xf32>
    %26 = arith.addf %20, %25 : vector<64x8xf32>
    %27 = vector.extract_strided_slice %1 {offsets = [1, 1, 0], sizes = [8, 8, 28], strides = [1, 1, 1]} : vector<10x10x28xbf16> to vector<8x8x28xbf16>
    %28 = vector.shape_cast %27 : vector<8x8x28xbf16> to vector<64x28xbf16>
    %c4 = arith.constant 4 : index
    %c0_16 = arith.constant 0 : index
    %c0_17 = arith.constant 0 : index
    %29 = vector.load %arg2[%c4, %c0_16, %c0_17] : memref<9x28x8xbf16, #tpu.memory_space<vmem>>, vector<1x28x8xbf16>
    %30 = vector.shape_cast %29 : vector<1x28x8xbf16> to vector<28x8xbf16>
    %cst_18 = arith.constant dense<0.000000e+00> : vector<64x8xf32>
    %31 = tpu.matmul %28, %30, %cst_18 {dimension_numbers = #tpu.dot_dimension_numbers<[1], [0], [0], [1], [0, 0, 1, 1], [], []>} : vector<64x28xbf16>, vector<28x8xbf16>, vector<64x8xf32> -> vector<64x8xf32>
    %32 = arith.addf %26, %31 : vector<64x8xf32>
    %33 = vector.extract_strided_slice %1 {offsets = [1, 2, 0], sizes = [8, 8, 28], strides = [1, 1, 1]} : vector<10x10x28xbf16> to vector<8x8x28xbf16>
    %34 = vector.shape_cast %33 : vector<8x8x28xbf16> to vector<64x28xbf16>
    %c5 = arith.constant 5 : index
    %c0_19 = arith.constant 0 : index
    %c0_20 = arith.constant 0 : index
    %35 = vector.load %arg2[%c5, %c0_19, %c0_20] : memref<9x28x8xbf16, #tpu.memory_space<vmem>>, vector<1x28x8xbf16>
    %36 = vector.shape_cast %35 : vector<1x28x8xbf16> to vector<28x8xbf16>
    %cst_21 = arith.constant dense<0.000000e+00> : vector<64x8xf32>
    %37 = tpu.matmul %34, %36, %cst_21 {dimension_numbers = #tpu.dot_dimension_numbers<[1], [0], [0], [1], [0, 0, 1, 1], [], []>} : vector<64x28xbf16>, vector<28x8xbf16>, vector<64x8xf32> -> vector<64x8xf32>
    %38 = arith.addf %32, %37 : vector<64x8xf32>
    %39 = vector.extract_strided_slice %1 {offsets = [2, 0, 0], sizes = [8, 8, 28], strides = [1, 1, 1]} : vector<10x10x28xbf16> to vector<8x8x28xbf16>
    %40 = vector.shape_cast %39 : vector<8x8x28xbf16> to vector<64x28xbf16>
    %c6 = arith.constant 6 : index
    %c0_22 = arith.constant 0 : index
    %c0_23 = arith.constant 0 : index
    %41 = vector.load %arg2[%c6, %c0_22, %c0_23] : memref<9x28x8xbf16, #tpu.memory_space<vmem>>, vector<1x28x8xbf16>
    %42 = vector.shape_cast %41 : vector<1x28x8xbf16> to vector<28x8xbf16>
    %cst_24 = arith.constant dense<0.000000e+00> : vector<64x8xf32>
    %43 = tpu.matmul %40, %42, %cst_24 {dimension_numbers = #tpu.dot_dimension_numbers<[1], [0], [0], [1], [0, 0, 1, 1], [], []>} : vector<64x28xbf16>, vector<28x8xbf16>, vector<64x8xf32> -> vector<64x8xf32>
    %44 = arith.addf %38, %43 : vector<64x8xf32>
    %45 = vector.extract_strided_slice %1 {offsets = [2, 1, 0], sizes = [8, 8, 28], strides = [1, 1, 1]} : vector<10x10x28xbf16> to vector<8x8x28xbf16>
    %46 = vector.shape_cast %45 : vector<8x8x28xbf16> to vector<64x28xbf16>
    %c7 = arith.constant 7 : index
    %c0_25 = arith.constant 0 : index
    %c0_26 = arith.constant 0 : index
    %47 = vector.load %arg2[%c7, %c0_25, %c0_26] : memref<9x28x8xbf16, #tpu.memory_space<vmem>>, vector<1x28x8xbf16>
    %48 = vector.shape_cast %47 : vector<1x28x8xbf16> to vector<28x8xbf16>
    %cst_27 = arith.constant dense<0.000000e+00> : vector<64x8xf32>
    %49 = tpu.matmul %46, %48, %cst_27 {dimension_numbers = #tpu.dot_dimension_numbers<[1], [0], [0], [1], [0, 0, 1, 1], [], []>} : vector<64x28xbf16>, vector<28x8xbf16>, vector<64x8xf32> -> vector<64x8xf32>
    %50 = arith.addf %44, %49 : vector<64x8xf32>
    %51 = vector.extract_strided_slice %1 {offsets = [2, 2, 0], sizes = [8, 8, 28], strides = [1, 1, 1]} : vector<10x10x28xbf16> to vector<8x8x28xbf16>
    %52 = vector.shape_cast %51 : vector<8x8x28xbf16> to vector<64x28xbf16>
    %c8 = arith.constant 8 : index
    %c0_28 = arith.constant 0 : index
    %c0_29 = arith.constant 0 : index
    %53 = vector.load %arg2[%c8, %c0_28, %c0_29] : memref<9x28x8xbf16, #tpu.memory_space<vmem>>, vector<1x28x8xbf16>
    %54 = vector.shape_cast %53 : vector<1x28x8xbf16> to vector<28x8xbf16>
    %cst_30 = arith.constant dense<0.000000e+00> : vector<64x8xf32>
    %55 = tpu.matmul %52, %54, %cst_30 {dimension_numbers = #tpu.dot_dimension_numbers<[1], [0], [0], [1], [0, 0, 1, 1], [], []>} : vector<64x28xbf16>, vector<28x8xbf16>, vector<64x8xf32> -> vector<64x8xf32>
    %56 = arith.addf %50, %55 : vector<64x8xf32>
    %c0_31 = arith.constant 0 : index
    %c0_32 = arith.constant 0 : index
    %c0_33 = arith.constant 0 : index
    %57 = vector.load %arg3[%c0_31, %c0_32, %c0_33] : memref<1x64x8xf32, #tpu.memory_space<vmem>>, vector<1x64x8xf32>
    %58 = vector.shape_cast %57 : vector<1x64x8xf32> to vector<64x8xf32>
    %59 = vector.shape_cast %56 : vector<64x8xf32> to vector<1x64x8xf32>
    tpu.vector_store %arg3[%c0_31, %c0_32, %c0_33], %59 {strides = array<i32>} : memref<1x64x8xf32, #tpu.memory_space<vmem>>, vector<1x64x8xf32>,
    return
  }
  func.func @transform_0(%arg0: i32) -> (i32, i32, i32, i32) {
    %c0_i32 = arith.constant 0 : i32
    %c0_i32_0 = arith.constant 0 : i32
    %c0_i32_1 = arith.constant 0 : i32
    %c0_i32_2 = arith.constant 0 : i32
    return %arg0, %c0_i32, %c0_i32_0, %c0_i32_1 : i32, i32, i32, i32
  }
  func.func @transform_1(%arg0: i32) -> (i32, i32, i32) {
    %c0_i32 = arith.constant 0 : i32
    %c0_i32_0 = arith.constant 0 : i32
    %c0_i32_1 = arith.constant 0 : i32
    %c0_i32_2 = arith.constant 0 : i32
    return %c0_i32, %c0_i32_0, %c0_i32_1 : i32, i32, i32
  }
  func.func @transform_2(%arg0: i32) -> (i32, i32, i32) {
    %c0_i32 = arith.constant 0 : i32
    %c0_i32_0 = arith.constant 0 : i32
    %c0_i32_1 = arith.constant 0 : i32
    return %arg0, %c0_i32, %c0_i32_0 : i32, i32, i32
  }
}

</mosaic_0001>

<bundles_post_ra>
// kernel: tpu_custom_call.1
= control target key start
LH: loop header
LB: loop body
LE: loop exit
PB: predicated region body
PF: predicated region fallthrough
CT: control target
= control target key end

     0   :  { %s1755_s9 = smov 0   ;;  %s2222_s0 = inlined_call_operand.vmem [shape: bf16[2,10,10,28], index: 0, kind: input, shape index: {}]   ;;  %s2223_s1 = inlined_call_operand.vmem [shape: bf16[9,28,8], index: 1, kind: input, shape index: {}]   ;;  %s2224_s2 = inlined_call_operand.vmem [shape: f32[2,64,8], index: 2, kind: output, shape index: {}]  }
   0x1 LB: > { %s1386_s10 = sadd.s32 4294967295, %s1738_s9   ;;  %p1390_p0 = scmp.ge.s32.totalorder %s1738_s9, 1  ;;  %s1738_s9 = sphi %s1755_s9, %s12_s9  }
   0x2   : > { %p112_p1 = scmp.lt.s32.totalorder %s1738_s9, 3 }
   0x4   : > { %p113_p2 = pnand %p1390_p0, %p112_p1 }
   0x6   : > { %116 = sbr.rel (%p113_p2) target bundleno = 313 (0x139), region = 28 }
   0xb   : > { %v1705_v0 = vld [vmem:[%s2223_s1 + $0x18] sm:$0x3f]   ;;  %vm325_vm0 = vcmask 1045504   ;;  %v1706_v1 = vld [vmem:[%s2223_s1 + $0x10] sm:$0xff]   ;;  %p134_p3 = scmp.lt.s32.totalorder %s1386_s10, 1  ;;  %vm312_vm3 = vcmask 228352  }
   0xc   : > { %1687 = vmatprep.subr.msk.bf16.mxu1 %vm325_vm0, %v1705_v0  ;;  %1686 = vmatprep.subr.msk.bf16.mxu0 %vm325_vm0, %v1705_v0  ;;  %v327_v2 = vsel %vm325_vm0, %v1705_v0, 0  ;;  %v1707_v3 = vld [vmem:[%s2223_s1 + $0x8] sm:$0x3f]   ;;  %vm169_vm1 = vsmask.f32 3328  ;;  %vm513_vm5 = vcmask 1042432  }
   0xd   : > { %1684 = vmatpush3.bf16.msra.mxu1 %v327_v2  ;;  %1575 = vmatpush3.bf16.msra.mxu0 %v327_v2  ;;  %s2232_s10 = smov (!%p134_p3, %s1386_s10), 1  ;;  %v1708_v4 = vld [vmem:[%s2223_s1 + $0x28] sm:$0x3f]   ;;  %vm170_vm2 = vsmask.f32 7440  ;;  %v1818_v26 = vsel %vm325_vm0, %v1707_v3, 0 }
   0xe   : > { %1683 = vmatprep.subr.bf16.mxu1 %v1706_v1  ;;  %1576 = vmatprep.subr.bf16.mxu0 %v1706_v1  ;;  %s1696_s19 = smul.u32 80, %s2232_s10  ;;  %v1822_v30 = vsel %vm325_vm0, %v1708_v4, 0  ;;  %vm1826_vm4 = vmor %vm169_vm1, %vm170_vm2  ;;  %vm514_vm6 = vcmask 1046532   ;;  %s1519_s25 = sshll.u32 %s2232_s10, 6  ;;  %vm1322_vm8 = vcmask 64512  }
   0xf   : > { %vm1908_vm7 = vmor %vm513_vm5, %vm514_vm6  ;;  %s2194_s28 = scalar_lea.vmem %s2224_s2, %s1519_s25 }
  0x10   : > { %s1784_s22 = scalar_lea.vmem %s2222_s0, %s1696_s19 }
  0x11   : > { %1685 = vmatpush3.bf16.msra.mxu1 %v1706_v1  ;;  %1577 = vmatpush3.bf16.msra.mxu0 %v1706_v1  ;;  %v1789_v5 = vld [vmem:[%s1784_s22] sm:$0xf]  ;;  %v1792_v6 = vld [vmem:[%s1784_s22 + $0x4] sm:$0x1]  ;;  %v1795_v7 = vld [vmem:[%s1784_s22 + $0x8] sm:$0xf] }
  0x12   : > { %1688 = vmatprep.subr.msk.bf16.mxu1 %vm325_vm0, %v1707_v3  ;;  %1689 = vmatprep.subr.msk.bf16.mxu0 %vm325_vm0, %v1708_v4  ;;  %v1798_v8 = vld [vmem:[%s1784_s22 + $0xc] sm:$0x1]  ;;  %v1801_v9 = vld [vmem:[%s1784_s22 + $0x10] sm:$0xf]  ;;  %v173_v10 = vshrl.u32 %v1789_v5, 16  ;;  %v176_v11 = vshll.u32 %v1789_v5, 16 }
  0x13   : > { %v182_v12 = vshll.u32 %v1792_v6, 16  ;;  %v187_v13 = vshrl.u32 %v1795_v7, 16  ;;  %v1808_v14 = vld [vmem:[%s1784_s22 + $0x14] sm:$0x1]  ;;  %v190_v15 = vshll.u32 %v1795_v7, 16  ;;  %v196_v16 = vshll.u32 %v1798_v8, 16 }
  0x14   : > { %v201_v17 = vshrl.u32 %v1801_v9, 16  ;;  %v204_v18 = vshll.u32 %v1801_v9, 16  ;;  %v175_v19 = vrot.slane %v173_v10, 4  ;;  %v178_v20 = vrot.slane %v176_v11, 5  ;;  %v1815_v22 = vld [vmem:[%s1784_s22 + $0x18] sm:$0xf] }
  0x15   : > { %v189_v21 = vrot.slane %v187_v13, 4  ;;  %v192_v23 = vrot.slane %v190_v15, 5  ;;  %v184_v28 = vrot.slane %v182_v12, 5  ;;  %v210_v29 = vshll.u32 %v1808_v14, 16  ;;  %v1831_v35 = vld [vmem:[%s1784_s22 + $0x1c] sm:$0x1] }
  0x16   : > { %v203_v24 = vrot.slane %v201_v17, 4  ;;  %v206_v25 = vrot.slane %v204_v18, 5  ;;  %v179_v27 = vor.u32 %v178_v20, %v175_v19  ;;  %v198_v33 = vrot.slane %v196_v16, 5  ;;  %v1834_v36 = vld [vmem:[%s1784_s22 + $0x20] sm:$0xf] }
  0x17   : > { %v193_v32 = vor.u32 %v192_v23, %v189_v21  ;;  %v215_v37 = vshrl.u32 %v1815_v22, 16  ;;  %v212_v39 = vrot.slane %v210_v29, 5  ;;  %v1838_v40 = vld [vmem:[%s1784_s22 + $0x24] sm:$0x1]  ;;  %v1841_v41 = vld [vmem:[%s1784_s22 + $0x28] sm:$0xf] }
  0x18   : > { %v207_v34 = vor.u32 %v206_v25, %v203_v24  ;;  %v180_v38 = vrot.slane %v179_v27, 4  ;;  %v1844_v44 = vld [vmem:[%s1784_s22 + $0x2c] sm:$0x1]  ;;  %v1847_v45 = vld [vmem:[%s1784_s22 + $0x30] sm:$0xf]  ;;  %v218_v47 = vshll.u32 %v1815_v22, 16 }
  0x19   : > { %v194_v42 = vrot.slane %v193_v32, 4  ;;  %v217_v46 = vrot.slane %v215_v37, 4  ;;  %v1853_v49 = vld [vmem:[%s1784_s22 + $0x34] sm:$0x1]  ;;  %v224_v50 = vshll.u32 %v1831_v35, 16  ;;  %v229_v51 = vshrl.u32 %v1834_v36, 16 }
  0x1a   : > { %v208_v43 = vrot.slane %v207_v34, 4  ;;  %v185_v48 = vsel %vm1826_vm4, %v180_v38, %v184_v28  ;;  %v232_v52 = vshll.u32 %v1834_v36, 16  ;;  %v518_v54 = vrot.slane %v1792_v6, 5  ;;  %v1869_v58 = vld [vmem:[%s1784_s22 + $0x38] sm:$0xf]  ;;  %v1710_v37 = vld [vmem:[%s2223_s1 + $0x20] sm:$0xff]  }
  0x1b   : > { %v1860_v53 = vsel %vm1826_vm4, %v194_v42, %v198_v33  ;;  %v220_v55 = vrot.slane %v218_v47, 5  ;;  %v231_v59 = vrot.slane %v229_v51, 4  ;;  %v238_v60 = vshll.u32 %v1838_v40, 16  ;;  %v1873_v61 = vld [vmem:[%s1784_s22 + $0x3c] sm:$0x1] }
  0x1c   : > { %v1865_v56 = vsel %vm1826_vm4, %v208_v43, %v212_v39  ;;  %v1398_v57 = vcombine.low %v185_v48, %v1860_v53  ;;  %v226_v63 = vrot.slane %v224_v50, 5  ;;  %v234_v0 = vrot.slane %v232_v52, 5 }
  0x1d   : > { %v221_v62 = vor.u32 %v220_v55, %v217_v46  ;;  %v243_v1 = vshrl.u32 %v1841_v41, 16  ;;  %v246_v2 = vshll.u32 %v1841_v41, 16  ;;  %v252_v3 = vshll.u32 %v1844_v44, 16 }
  0x1e   : > { %1578 = vmatprep.mubr.msk.bf16.mxu0 %vm312_vm3, %v1398_v57  ;;  %v257_v4 = vshrl.u32 %v1847_v45, 16  ;;  %v260_v6 = vshll.u32 %v1847_v45, 16  ;;  %v235_v11 = vor.u32 %v234_v0, %v231_v59  ;;  %v266_v13 = vshll.u32 %v1853_v49, 16 }
  0x1f   : > { %v222_v10 = vrot.slane %v221_v62, 4  ;;  %v245_v12 = vrot.slane %v243_v1, 4  ;;  %v240_v15 = vrot.slane %v238_v60, 5  ;;  %v248_v16 = vrot.slane %v246_v2, 5 }
  0x20   : > { %v259_v17 = vrot.slane %v257_v4, 4  ;;  %v262_v18 = vrot.slane %v260_v6, 5  ;;  %v236_v20 = vrot.slane %v235_v11, 4  ;;  %v254_v21 = vrot.slane %v252_v3, 5  ;;  %v1709_v3 = vld [vmem:[%s2223_s1] sm:$0xff]  }
  0x21   : > { %v1884_v19 = vsel %vm1826_vm4, %v222_v10, %v226_v63  ;;  %v271_v23 = vshrl.u32 %v1869_v58, 16  ;;  %v249_v24 = vor.u32 %v248_v16, %v245_v12  ;;  %v274_v27 = vshll.u32 %v1869_v58, 16 }
  0x22   : > { %v263_v25 = vor.u32 %v262_v18, %v259_v17  ;;  %v280_v28 = vshll.u32 %v1873_v61, 16  ;;  %v522_v29 = vrot.slane %v1798_v8, 5  ;;  %v268_v32 = vrot.slane %v266_v13, 5  ;;  %v1976_v13 = vld [vmem:[%s1784_s22 + $0x40] sm:$0xf] }
  0x23   : > { %v273_v33 = vrot.slane %v271_v23, 4  ;;  %v1892_v34 = vcombine.low %v1865_v56, %v1884_v19  ;;  %v1899_v38 = vsel %vm1826_vm4, %v236_v20, %v240_v15  ;;  %v250_v39 = vrot.slane %v249_v24, 4  ;;  %v1718_v20 = vld [vmem:[%s2223_s1 + $0x40] sm:$0xff]  }
  0x24   : > { %v264_v42 = vrot.slane %v263_v25, 4  ;;  %v276_v43 = vrot.slane %v274_v27, 5  ;;  %v526_v46 = vrot.slane %v1808_v14, 5  ;;  %v282_v8 = vrot.slane %v280_v28, 5  ;;  %v1712_v25 = vld [vmem:[%s2223_s1 + $0x38] sm:$0x3f]  }
  0x25   : > { %v530_v47 = vrot.slane %v1831_v35, 5  ;;  %v534_v48 = vrot.slane %v1838_v40, 5  ;;  %1579 = vmatmul.mubr.msk.bf16.vlgmr.msra.gmra.mxu0 %vm312_vm3, %v1892_v34  ;;  %v1914_v51 = vsel %vm1826_vm4, %v250_v39, %v254_v21  ;;  %v538_v14 = vrot.slane %v1844_v44, 5  ;;  %v1714_v40 = vld [vmem:[%s2223_s1 + $0x48] sm:$0x3f]  }
  0x26   : > { %v277_v52 = vor.u32 %v276_v43, %v273_v33  ;;  %1599 = vmatpush3.bf16.msra.mxu0 %v1822_v30  ;;  %v1418_v35 = vrot.slane %v1789_v5, 9  ;;  %v1924_v55 = vcombine.low %v1899_v38, %v1914_v51  ;;  %v1408_v57 = vcombine.low %v1789_v5, %v1795_v7  ;;  %v1722_v28 = vld [vmem:[%s2223_s1 + $0x68] sm:$0x3f]  }
  0x27   : > { %1600 = vmatprep.subr.bf16.mxu0 %v1710_v37  ;;  %v1419_v59 = vrot.slane %v1795_v7, 9  ;;  %v1420_v44 = vrot.slane %v1801_v9, 9  ;;  %v1932_v30 = vsel %vm1826_vm4, %v264_v42, %v268_v32  ;;  %v1421_v63 = vrot.slane %v1815_v22, 9  ;;  %v1716_v42 = vld [vmem:[%s2223_s1 + $0x30] sm:$0xff]  }
  0x28   : > { %v278_v60 = vrot.slane %v277_v52, 4  ;;  %v519_v62 = vsel %vm1908_vm7, %v1418_v35, %v518_v54  ;;  %1582 = vmatprep.mubr.msk.bf16.mxu1 %vm312_vm3, %v1924_v55  ;;  %v542_v5 = vrot.slane %v1853_v49, 5  ;;  %v1422_v2 = vrot.slane %v1834_v36, 9 }
  0x29   : > { %v1942_v0 = vsel %vm1908_vm7, %v1419_v59, %v522_v29  ;;  %v1946_v1 = vsel %vm1908_vm7, %v1420_v44, %v526_v46  ;;  %v1959_v4 = vsel %vm1908_vm7, %v1421_v63, %v530_v47  ;;  %v1423_v6 = vrot.slane %v1841_v41, 9  ;;  %v2019_v29 = vld [vmem:[%s1784_s22 + $0x4c] sm:$0x1]  ;;  %v1720_v59 = vld [vmem:[%s2223_s1 + $0x58] sm:$0x3f]  }
  0x2a   : > { %v1951_v54 = vsel %vm1826_vm4, %v278_v60, %v282_v8  ;;  %1601 = vmatpush3.bf16.msra.mxu0 %v1710_v37  ;;  %v1430_v49 = vcombine.low %v519_v62, %v1942_v0  ;;  %v1968_v11 = vcombine.low %v1946_v1, %v1959_v4  ;;  %v1973_v12 = vsel %vm1908_vm7, %v1422_v2, %v534_v48  ;;  %v2037_v8 = vld [vmem:[%s1784_s22 + $0x48] sm:$0xf]  ;;  %v2042_v48 = vld [vmem:[%s1784_s22 + $0x44] sm:$0x1] }
  0x2b   : > { %v1964_v10 = vcombine.low %v1932_v30, %v1951_v54  ;;  %1691 = vmatprep.subr.msk.bf16.mxu0 %vm325_vm0, %v1714_v40  ;;  %v822_v15 = vsel %vm325_vm0, %v1714_v40, 0  ;;  %v1982_v16 = vsel %vm1908_vm7, %v1423_v6, %v538_v14  ;;  %v1424_v17 = vrot.slane %v1847_v45, 9 }
  0x2c   : > { %1602 = vmatprep.mubr.msk.bf16.mxu0 %vm312_vm3, %v1430_v49  ;;  %v1425_v18 = vrot.slane %v1869_v58, 9  ;;  %v1995_v21 = vcombine.low %v1973_v12, %v1982_v16  ;;  %v546_v23 = vrot.slane %v1873_v61, 5  ;;  %v775_v61 = vshrl.u32 %v1976_v13, 16 }
  0x2d   : > { %1583 = vmatmul.mubr.msk.bf16.vlgmr.msra.gmra.mxu1 %vm312_vm3, %v1964_v10  ;;  %1603 = vmatmul.mubr.msk.bf16.vlgmr.msra.gmra.mxu0 %vm312_vm3, %v1968_v11  ;;  %v2002_v24 = vsel %vm1908_vm7, %v1424_v17, %v542_v5  ;;  %v1409_v32 = vcombine.low %v1801_v9, %v1815_v22  ;;  %v1458_v37 = vcombine.low %v1860_v53, %v1865_v56  ;;  %v699_v47 = vsel %vm325_vm0, %v1712_v25, 0 }
  0x2e   : > { %1587 = vmatpush3.bf16.msra.mxu1 %v1818_v26  ;;  %1590 = vmatprep.mubr.msk.bf16.mxu1 %vm312_vm3, %v1408_v57  ;;  %v2009_v27 = vsel %vm1908_vm7, %v1425_v18, %v546_v23  ;;  %v778_v26 = vshll.u32 %v1976_v13, 16  ;;  %v2031_v39 = vcombine.low %v1834_v36, %v1841_v41  ;;  %v777_v43 = vrot.slane %v775_v61, 4 }
  0x2f   : > { %1588 = vmatprep.subr.bf16.mxu1 %v1709_v3  ;;  %1623 = vmatpush3.bf16.msra.mxu0 %v822_v15  ;;  %v2025_v33 = vcombine.low %v2002_v24, %v2009_v27  ;;  %v1110_v53 = vshrl.u32 %v2037_v8, 16  ;;  %v1113_v56 = vshll.u32 %v2037_v8, 16  ;;  %v1119_v52 = vshll.u32 %v2019_v29, 16 }
  0x30   : > { %1606 = vmatprep.mubr.msk.bf16.mxu0 %vm312_vm3, %v1995_v21  ;;  %1624 = vmatprep.subr.bf16.mxu0 %v1718_v20  ;;  %v780_v46 = vrot.slane %v778_v26, 5  ;;  %v784_v57 = vshll.u32 %v2042_v48, 16  ;;  %v1459_v62 = vcombine.low %v1884_v19, %v1899_v38  ;;  %v1411_v63 = vcombine.low %v1847_v45, %v1869_v58  ;;  %v1726_v19 = vld [vmem:[%s2223_s1 + $0x60] sm:$0xff]   ;;  %v1729_v26 = vld [vmem:[%s2223_s1 + $0x70] sm:$0xff]  }
  0x31   : > { %v1112_v14 = vrot.slane %v1110_v53, 4  ;;  %v1115_v35 = vrot.slane %v1113_v56, 5  ;;  %v2058_v60 = vrot.slane %v1119_v52, 5  ;;  %v1444_v2 = vcombine.low %v1795_v7, %v1801_v9  ;;  %v1728_v9 = vld [vmem:[%s2223_s1 + $0x88] sm:$0x3f]  }
  0x32   : > { %1589 = vmatpush3.bf16.msra.mxu1 %v1709_v3  ;;  %v781_v40 = vor.u32 %v780_v46, %v777_v43  ;;  %v786_v49 = vrot.slane %v784_v57, 5  ;;  %v1460_v6 = vcombine.low %v1914_v51, %v1932_v30  ;;  %v1034_v15 = vsel %vm325_vm0, %v1722_v28, 0 }
  0x33   : > { %1690 = vmatprep.subr.msk.bf16.mxu1 %vm325_vm0, %v1712_v25  ;;  %1625 = vmatpush3.bf16.msra.mxu0 %v1718_v20  ;;  %v1116_v44 = vor.u32 %v1115_v35, %v1112_v14  ;;  %v1445_v51 = vcombine.low %v1815_v22, %v1834_v36  ;;  %v1446_v17 = vcombine.low %v1841_v41, %v1847_v45  ;;  %v936_v18 = vsel %vm325_vm0, %v1720_v59, 0  ;;  %v1724_v20 = vld [vmem:[%s2223_s1 + $0x50] sm:$0xff]   ;;  %v1727_v22 = vld [vmem:[%s2223_s1 + $0x78] sm:$0x3f]  }
  0x34   : > { %1693 = vmatprep.subr.msk.bf16.mxu0 %vm325_vm0, %v1722_v28  ;;  %v782_v3 = vrot.slane %v781_v40, 4  ;;  %v1447_v36 = vcombine.low %v1869_v58, %v1976_v13  ;;  %v1473_v41 = vcombine.low %v1942_v0, %v1946_v1  ;;  %v1247_v45 = vsel %vm325_vm0, %v1728_v9, 0 }
  0x35   : > { %1591 = vmatmul.mubr.msk.bf16.vlgmr.msra.gmra.mxu1 %vm312_vm3, %v1409_v32  ;;  %1607 = vmatmul.mubr.msk.bf16.gmra.mxu0 %vm312_vm3, %v2025_v33  ;;  %v2064_v5 = vrot.slane %v1116_v44, 4  ;;  %v1474_v58 = vcombine.low %v1959_v4, %v1973_v12  ;;  %v1487_v0 = vcombine.low %v1976_v13, %v2037_v8  ;;  %v1475_v1 = vcombine.low %v1982_v16, %v2002_v24 }
  0x36   : > { %1611 = vmatpush3.bf16.msra.mxu1 %v699_v47  ;;  %1594 = vmatprep.mubr.msk.bf16.mxu1 %vm312_vm3, %v2031_v39  ;;  %v787_v7 = vsel %vm1826_vm4, %v782_v3, %v786_v49  ;;  %v1468_v23 = vrot.slane %v1976_v13, 9  ;;  %v900_v25 = vrot.slane %v2042_v48, 5  ;;  %v1145_v61 = vsel %vm325_vm0, %v1727_v22, 0 }
  0x37   : > { %1612 = vmatprep.subr.bf16.mxu1 %v1716_v42  ;;  %1626 = vmatprep.mubr.msk.bf16.mxu0 %vm312_vm3, %v1458_v37  ;;  %v1122_v38 = vsel %vm1826_vm4, %v2064_v5, %v2058_v60  ;;  %v1461_v30 = vcombine.low %v1951_v54, %v787_v7  ;;  %v1731_v54 = vld [vmem:[%s2223_s1 + $0x80] sm:$0xff]   ;;  %v1505_v13 = vrot.slane %v2037_v8, 9  ;;  %v1223_v16 = vrot.slane %v2019_v29, 5 }
  0x38   : > { %v901_v4 = vsel %vm1908_vm7, %v1468_v23, %v900_v25 }
  0x39   : > { %v1476_v12 = vcombine.low %v2009_v27, %v901_v4 }
  0x3a   : > { %1613 = vmatpush3.bf16.msra.mxu1 %v1716_v42 }
  0x3b   : > { %1692 = vmatprep.subr.msk.bf16.mxu1 %vm325_vm0, %v1720_v59 }
  0x3d   : > { %1595 = vmatmul.mubr.msk.bf16.gmra.mxu1 %vm312_vm3, %v1411_v63  ;;  %1627 = vmatmul.mubr.msk.bf16.vlgmr.msra.gmra.mxu0 %vm312_vm3, %v1459_v62 }
  0x3e   : > { %1614 = vmatprep.mubr.msk.bf16.mxu1 %vm312_vm3, %v1444_v2  ;;  %1647 = vmatpush3.bf16.msra.mxu0 %v1034_v15 }
  0x3f   : > { %1630 = vmatprep.mubr.msk.bf16.mxu0 %vm312_vm3, %v1460_v6  ;;  %1648 = vmatprep.subr.bf16.mxu0 %v1726_v19 }
  0x42   : > { %1649 = vmatpush3.bf16.msra.mxu0 %v1726_v19 }
  0x43   : > { %1695 = vmatprep.subr.msk.bf16.mxu0 %vm325_vm0, %v1728_v9 }
  0x45   : > { %1615 = vmatmul.mubr.msk.bf16.vlgmr.msra.gmra.mxu1 %vm312_vm3, %v1445_v51  ;;  %1631 = vmatmul.mubr.msk.bf16.gmra.mxu0 %vm312_vm3, %v1461_v30 }
  0x46   : > { %1635 = vmatpush3.bf16.msra.mxu1 %v936_v18  ;;  %1618 = vmatprep.mubr.msk.bf16.mxu1 %vm312_vm3, %v1446_v17 }
  0x47   : > { %1636 = vmatprep.subr.bf16.mxu1 %v1724_v20  ;;  %1650 = vmatprep.mubr.msk.bf16.mxu0 %vm312_vm3, %v1409_v32 }
  0x4a   : > { %1637 = vmatpush3.bf16.msra.mxu1 %v1724_v20 }
  0x4b   : > { %1694 = vmatprep.subr.msk.bf16.mxu1 %vm325_vm0, %v1727_v22 }
  0x4d   : > { %1619 = vmatmul.mubr.msk.bf16.gmra.mxu1 %vm312_vm3, %v1447_v36  ;;  %1651 = vmatmul.mubr.msk.bf16.vlgmr.msra.gmra.mxu0 %vm312_vm3, %v2031_v39 }
  0x4e   : > { %1638 = vmatprep.mubr.msk.bf16.mxu1 %vm312_vm3, %v1473_v41  ;;  %1671 = vmatpush3.bf16.msra.mxu0 %v1247_v45 }
  0x4f   : > { %1654 = vmatprep.mubr.msk.bf16.mxu0 %vm312_vm3, %v1411_v63  ;;  %1672 = vmatprep.subr.bf16.mxu0 %v1731_v54 }
  0x52   : > { %1673 = vmatpush3.bf16.msra.mxu0 %v1731_v54 }
  0x55   : > { %1639 = vmatmul.mubr.msk.bf16.vlgmr.msra.gmra.mxu1 %vm312_vm3, %v1474_v58  ;;  %1655 = vmatmul.mubr.msk.bf16.gmra.mxu0 %vm312_vm3, %v1487_v0 }
  0x56   : > { %1659 = vmatpush3.bf16.msra.mxu1 %v1145_v61  ;;  %1642 = vmatprep.mubr.msk.bf16.mxu1 %vm312_vm3, %v1475_v1 }
  0x57   : > { %1660 = vmatprep.subr.bf16.mxu1 %v1729_v26  ;;  %1674 = vmatprep.mubr.msk.bf16.mxu0 %vm312_vm3, %v1968_v11  ;;  %v1224_v11 = vsel %vm1908_vm7, %v1505_v13, %v1223_v16 }
  0x58   : > { %v1510_v24 = vcombine.low %v901_v4, %v1224_v11 }
  0x5a   : > { %1661 = vmatpush3.bf16.msra.mxu1 %v1729_v26 }
  0x5d   : > { %1643 = vmatmul.mubr.msk.bf16.gmra.mxu1 %vm312_vm3, %v1476_v12  ;;  %1675 = vmatmul.mubr.msk.bf16.vlgmr.msra.gmra.mxu0 %vm312_vm3, %v1995_v21 }
  0x5e   : > { %1662 = vmatprep.mubr.msk.bf16.mxu1 %vm312_vm3, %v1892_v34  ;;  %1678 = vmatprep.mubr.msk.bf16.mxu0 %vm312_vm3, %v2025_v33  ;;  %v1498_v34 = vcombine.low %v787_v7, %v1122_v38 }
  0x65   : > { %1663 = vmatmul.mubr.msk.bf16.vlgmr.msra.gmra.mxu1 %vm312_vm3, %v1924_v55  ;;  %1679 = vmatmul.mubr.msk.bf16.gmra.mxu0 %vm312_vm3, %v1510_v24 }
  0x66   : > { %1666 = vmatprep.mubr.msk.bf16.mxu1 %vm312_vm3, %v1964_v10 }
  0x6d   : > { %1667 = vmatmul.mubr.msk.bf16.gmra.mxu1 %vm312_vm3, %v1498_v34 }
  0xe5   : > { %v1580_v21 = vpop.f32.mrf.mxu0 }
  0xe7   : > { %v363_v50 = vpop.f32.mrf.mxu0 }
  0xe9   : > { %v1581_v27 = vpop.f32.mrf.mxu0 }
  0xeb   : > { %v366_v28 = vpop.f32.mrf.mxu0 }
  0xed   : > { %v1584_v29 = vpop.f32.mrf.mxu1  ;;  %v1604_v32 = vpop.f32.mrf.mxu0 }
  0xef   : > { %v379_v55 = vpop.f32.mrf.mxu1  ;;  %v625_v33 = vpop.f32.mrf.mxu0 }
  0xf1   : > { %v1585_v37 = vpop.f32.mrf.mxu1  ;;  %v1605_v39 = vpop.f32.mrf.mxu0 }
  0xf3   : > { %v2161_v42 = vpop.f32.mrf.mxu1  ;;  %v628_v10 = vpop.f32.mrf.mxu0 }
  0xf5   : > { %v1592_v31 = vpop.f32.mrf.mxu1  ;;  %v1608_v43 = vpop.f32.mrf.mxu0 }
  0xf6   : > { %v483_v20 = vadd.f32 %v1592_v31, %v1580_v21 }
  0xf7   : > { %v474_v46 = vpop.f32.mrf.mxu1  ;;  %v641_v8 = vpop.f32.mrf.mxu0 }
  0xf8   : > { %v475_v41 = vadd.f32 %v474_v46, %v363_v50  ;;  %v658_v58 = vadd.f32 %v1604_v32, %v483_v20 }
  0xf9   : > { %v1593_v47 = vpop.f32.mrf.mxu1  ;;  %v2163_v48 = vpop.f32.mrf.mxu0 }
  0xfa   : > { %v486_v0 = vadd.f32 %v1593_v47, %v1581_v27  ;;  %v656_v25 = vadd.f32 %v625_v33, %v475_v41 }
  0xfb   : > { %v477_v53 = vpop.f32.mrf.mxu1  ;;  %v2165_v56 = vpop.f32.mrf.mxu0 }
  0xfc   : > { %v478_v61 = vadd.f32 %v477_v53, %v366_v28  ;;  %v659_v13 = vadd.f32 %v1605_v39, %v486_v0 }
  0xfd   : > { %v1596_v52 = vpop.f32.mrf.mxu1  ;;  %v1628_v14 = vpop.f32.mrf.mxu0 }
  0xfe   : > { %v499_v16 = vadd.f32 %v1596_v52, %v1584_v29  ;;  %v657_v50 = vadd.f32 %v628_v10, %v478_v61 }
  0xff   : > { %v490_v35 = vpop.f32.mrf.mxu1  ;;  %v858_v40 = vpop.f32.mrf.mxu0 }
 0x100   : > { %v491_v24 = vadd.f32 %v490_v35, %v379_v55  ;;  %v662_v20 = vadd.f32 %v1608_v43, %v499_v16 }
 0x101   : > { %v1597_v57 = vpop.f32.mrf.mxu1  ;;  %v1629_v59 = vpop.f32.mrf.mxu0 }
 0x102   : > { %v502_v32 = vadd.f32 %v1597_v57, %v1585_v37  ;;  %v660_v53 = vadd.f32 %v641_v8, %v491_v24 }
 0x103   : > { %v493_v44 = vpop.f32.mrf.mxu1  ;;  %v861_v60 = vpop.f32.mrf.mxu0 }
 0x104   : > { %v663_v10 = vadd.f32 %v2163_v48, %v502_v32 }
 0x105   : > { %v1616_v62 = vpop.f32.mrf.mxu1  ;;  %v2167_v63 = vpop.f32.mrf.mxu0 }
 0x106   : > { %v768_v26 = vadd.f32 %v1616_v62, %v658_v58  ;;  %v494_v62 = vadd.f32 %v493_v44, %v2161_v42 }
 0x107   : > { %v735_v5 = vpop.f32.mrf.mxu1  ;;  %v2169_v2 = vpop.f32.mrf.mxu0 }
 0x108   : > { %v766_v11 = vadd.f32 %v735_v5, %v656_v25  ;;  %v891_v31 = vadd.f32 %v1628_v14, %v768_v26  ;;  %v661_v43 = vadd.f32 %v2165_v56, %v494_v62 }
 0x109   : > { %v1617_v3 = vpop.f32.mrf.mxu1  ;;  %v2171_v49 = vpop.f32.mrf.mxu0 }
 0x10a   : > { %v769_v46 = vadd.f32 %v1617_v3, %v659_v13 }
 0x10b   : > { %v738_v6 = vpop.f32.mrf.mxu1  ;;  %v2173_v15 = vpop.f32.mrf.mxu0 }
 0x10c   : > { %v767_v28 = vadd.f32 %v738_v6, %v657_v50  ;;  %v892_v52 = vadd.f32 %v1629_v59, %v769_v46 }
 0x10d   : > { %v1620_v19 = vpop.f32.mrf.mxu1  ;;  %v1652_v38 = vpop.f32.mrf.mxu0 }
 0x10e   : > { %v772_v55 = vadd.f32 %v1620_v19, %v662_v20  ;;  %v890_v37 = vadd.f32 %v861_v60, %v767_v28 }
 0x10f   : > { %v751_v7 = vpop.f32.mrf.mxu1  ;;  %v1070_v9 = vpop.f32.mrf.mxu0 }
 0x110   : > { %v770_v14 = vadd.f32 %v751_v7, %v660_v53  ;;  %v895_v42 = vadd.f32 %v2167_v63, %v772_v55 }
 0x111   : > { %v1621_v51 = vpop.f32.mrf.mxu1  ;;  %v1653_v30 = vpop.f32.mrf.mxu0 }
 0x112   : > { %v893_v19 = vadd.f32 %v2169_v2, %v770_v14 }
 0x113   : > { %v754_v17 = vpop.f32.mrf.mxu1  ;;  %v2175_v18 = vpop.f32.mrf.mxu0 }
 0x114   : > { %v771_v41 = vadd.f32 %v754_v17, %v661_v43 }
 0x115   : > { %v1640_v22 = vpop.f32.mrf.mxu1  ;;  %v2177_v36 = vpop.f32.mrf.mxu0 }
 0x116   : > { %v1005_v33 = vadd.f32 %v1640_v22, %v891_v31  ;;  %v894_v0 = vadd.f32 %v2173_v15, %v771_v41 }
 0x117   : > { %v972_v45 = vpop.f32.mrf.mxu1  ;;  %v2179_v54 = vpop.f32.mrf.mxu0 }
 0x118   : > { %v1103_v57 = vadd.f32 %v1652_v38, %v1005_v33 }
 0x119   : > { %v1641_v1 = vpop.f32.mrf.mxu1  ;;  %v2181_v23 = vpop.f32.mrf.mxu0 }
 0x11a   : > { %2229 = vst [vmem:[#allocation2_spill] sm:$0xff] %v2181_v23  ;;  %v889_v23 = vadd.f32 %v858_v40, %v766_v11  ;;  %v1006_v3 = vadd.f32 %v1641_v1, %v892_v52  ;;  %v773_v40 = vadd.f32 %v1621_v51, %v663_v10 }
 0x11b   : > { %v975_v4 = vpop.f32.mrf.mxu1  ;;  %v2183_v12 = vpop.f32.mrf.mxu0 }
 0x11c   : > { %v1003_v35 = vadd.f32 %v972_v45, %v889_v23  ;;  %v1004_v22 = vadd.f32 %v975_v4, %v890_v37  ;;  %v1104_v56 = vadd.f32 %v1653_v30, %v1006_v3  ;;  %v896_v63 = vadd.f32 %v2171_v49, %v773_v40 }
 0x11d   : > { %v1644_v34 = vpop.f32.mrf.mxu1  ;;  %v1676_v21 = vpop.f32.mrf.mxu0 }
 0x11e   : > { %v1101_v44 = vadd.f32 %v1070_v9, %v1003_v35  ;;  %v1009_v60 = vadd.f32 %v1644_v34, %v895_v42  ;;  %v1102_v2 = vadd.f32 %v2175_v18, %v1004_v22 }
 0x11f   : > { %v988_v27 = vpop.f32.mrf.mxu1  ;;  %v1283_v47 = vpop.f32.mrf.mxu0 }
 0x120   : > { %v1007_v17 = vadd.f32 %v988_v27, %v893_v19  ;;  %v1107_v1 = vadd.f32 %v2177_v36, %v1009_v60 }
 0x121   : > { %v1645_v39 = vpop.f32.mrf.mxu1  ;;  %v1677_v29 = vpop.f32.mrf.mxu0  ;;  %v2230_v11 = vld [vmem:[#allocation2_spill] sm:$0xff] }
 0x122   : > { %v1010_v23 = vadd.f32 %v1645_v39, %v896_v63  ;;  %v1105_v26 = vadd.f32 %v2179_v54, %v1007_v17 }
 0x123   : > { %v991_v5 = vpop.f32.mrf.mxu1  ;;  %v1286_v8 = vpop.f32.mrf.mxu0 }
 0x124   : > { %v1008_v4 = vadd.f32 %v991_v5, %v894_v0  ;;  %v1108_v36 = vadd.f32 %v2230_v11, %v1010_v23 }
 0x125   : > { %v1664_v6 = vpop.f32.mrf.mxu1  ;;  %v1680_v51 = vpop.f32.mrf.mxu0 }
 0x126   : > { %v1214_v59 = vadd.f32 %v1664_v6, %v1103_v57  ;;  %v1106_v31 = vadd.f32 %v2183_v12, %v1008_v4 }
 0x127   : > { %v1181_v48 = vpop.f32.mrf.mxu1  ;;  %v1299_v18 = vpop.f32.mrf.mxu0 }
 0x128   : > { %v1316_v38 = vadd.f32 %v1676_v21, %v1214_v59  ;;  %v1212_v7 = vadd.f32 %v1181_v48, %v1101_v44 }
 0x129   : > { %v1665_v9 = vpop.f32.mrf.mxu1  ;;  %v1681_v50 = vpop.f32.mrf.mxu0 }
 0x12a   : > { %1325 = vst.msk [vmem:[%s2194_s28 + $0x10] sm:$0xff] %vm1322_vm8, %v1316_v38  ;;  %v1314_v45 = vadd.f32 %v1283_v47, %v1212_v7  ;;  %v1215_v58 = vadd.f32 %v1665_v9, %v1104_v56 }
 0x12b   : > { %v1184_v30 = vpop.f32.mrf.mxu1  ;;  %v1302_v20 = vpop.f32.mrf.mxu0 }
 0x12c   : > { %1323 = vst.msk [vmem:[%s2194_s28] sm:$0xff] %vm1322_vm8, %v1314_v45  ;;  %v1317_v49 = vadd.f32 %v1677_v29, %v1215_v58  ;;  %v1213_v25 = vadd.f32 %v1184_v30, %v1102_v2 }
 0x12d   : > { %v1668_v61 = vpop.f32.mrf.mxu1 }
 0x12e   : > { %1326 = vst.msk [vmem:[%s2194_s28 + $0x18] sm:$0xff] %vm1322_vm8, %v1317_v49  ;;  %v1315_v13 = vadd.f32 %v1286_v8, %v1213_v25  ;;  %v1218_v15 = vadd.f32 %v1668_v61, %v1107_v1 }
 0x12f   : > { %v1197_v16 = vpop.f32.mrf.mxu1 }
 0x130   : > { %1324 = vst.msk [vmem:[%s2194_s28 + $0x8] sm:$0xff] %vm1322_vm8, %v1315_v13  ;;  %v1320_v24 = vadd.f32 %v1680_v51, %v1218_v15  ;;  %v1216_v34 = vadd.f32 %v1197_v16, %v1105_v26 }
 0x131   : > { %v1669_v21 = vpop.f32.mrf.mxu1 }
 0x132   : > { %1329 = vst.msk [vmem:[%s2194_s28 + $0x30] sm:$0xff] %vm1322_vm8, %v1320_v24  ;;  %v1318_v54 = vadd.f32 %v1299_v18, %v1216_v34  ;;  %v1219_v46 = vadd.f32 %v1669_v21, %v1108_v36 }
 0x133   : > { %v1200_v32 = vpop.f32.mrf.mxu1 }
 0x134   : > { %1327 = vst.msk [vmem:[%s2194_s28 + $0x20] sm:$0xff] %vm1322_vm8, %v1318_v54  ;;  %v1321_v27 = vadd.f32 %v1681_v50, %v1219_v46  ;;  %v1217_v47 = vadd.f32 %v1200_v32, %v1106_v31 }
 0x136   : > { %1330 = vst.msk [vmem:[%s2194_s28 + $0x38] sm:$0xff] %vm1322_vm8, %v1321_v27  ;;  %v1319_v28 = vadd.f32 %v1302_v20, %v1217_v47 }
 0x138   : > { %1328 = vst.msk [vmem:[%s2194_s28 + $0x28] sm:$0xff] %vm1322_vm8, %v1319_v28 }
 0x139 PF: > { %s12_s9 = sadd.s32 1, %s1738_s9  }
 0x13a   : > { %p9_p4 = scmp.ge.s32.totalorder %s12_s9, 4  }
 0x13c   :  { %11 = sbr.rel (!%p9_p4) target bundleno = 1 (0x1), region = 66 }

</bundles_post_ra>
